<compile_context>
chip_gen: v5e
topology: v5e:2x2
jax: 0.10.0
libtpu: 0.0.40
codegen_flags: <defaults>
</compile_context>

<pallas_src>
import jax
import jax.numpy as jnp
from jax.experimental import pallas as pl
from jax.experimental.pallas import tpu as pltpu


def _se_kernel(x_ref, w1_ref, w2_ref, o_ref):
    # x_ref : (B_tile, C, HW_pad)  activations (spatial zero-padded past HW)
    # w1_ref: (C, C_red)           fc1 weight, pre-transposed, pre-scaled by 1/HW
    # w2_ref: (C_red, C)           fc2 weight, pre-transposed
    x = x_ref[...]                                        # keep native dtype

    # Squeeze: global sum over the lane (spatial) axis; 1/HW is folded into w1.
    y = jnp.sum(x, axis=-1, dtype=jnp.float32)            # (B_tile, C)

    # Excitation: two bias-free linears, ReLU then sigmoid (f32 on MXU / EUP).
    h = jnp.maximum(
        jnp.dot(y, w1_ref[...], preferred_element_type=jnp.float32), 0.0)
    s = jax.nn.sigmoid(
        jnp.dot(h, w2_ref[...], preferred_element_type=jnp.float32))

    # Scale: broadcast the per-channel gate along the lane (spatial) axis.
    o_ref[...] = x * s[:, :, None].astype(x.dtype)


def _pick_b_tile(B, C, HW_pad, itemsize, budget_bytes=24 * 1024 * 1024):
    """Largest divisor of B whose double-buffered in+out block fits the budget,
    while keeping >= 2 grid steps (megacore) whenever B >= 2."""
    per_img = C * HW_pad * itemsize
    max_tile = max(1, budget_bytes // (4 * per_img))      # 2x in + 2x out buffers
    best = 1
    for d in range(1, B + 1):
        if B % d:
            continue
        if d > max_tile:
            break
        if B >= 2 and B // d < 2:
            continue
        best = d
    return best


def se_layer(x, w1, w2):
    """SE forward. x: (B, C, H, W); w1: (C_red, C); w2: (C, C_red) (PyTorch Linear layout)."""
    B, C, H, W = x.shape
    HW = H * W
    C_red = w1.shape[0]

    # Lane-dense spatial axis: pad H*W up to a multiple of 128.
    HW_pad = ((HW + 127) // 128) * 128
    x_flat = x.reshape(B, C, HW)
    if HW_pad != HW:
        x_flat = jnp.pad(x_flat, ((0, 0), (0, 0), (0, HW_pad - HW)))

    # Pre-transpose weights to (in, out), fold 1/HW into fc1, pre-cast to f32.
    w1_t = (w1.T / jnp.float32(HW)).astype(jnp.float32)   # (C, C_red)
    w2_t = w2.T.astype(jnp.float32)                       # (C_red, C)

    b_tile = _pick_b_tile(B, C, HW_pad, x.dtype.itemsize)

    out_flat = pl.pallas_call(
        _se_kernel,
        out_shape=jax.ShapeDtypeStruct((B, C, HW_pad), x.dtype),
        grid_spec=pltpu.PrefetchScalarGridSpec(
            num_scalar_prefetch=0,
            grid=(B // b_tile,),
            in_specs=[
                pl.BlockSpec((b_tile, C, HW_pad), lambda b: (b, 0, 0)),
                pl.BlockSpec((C, C_red), lambda b: (0, 0)),   # constant -> not re-DMA'd
                pl.BlockSpec((C_red, C), lambda b: (0, 0)),
            ],
            out_specs=pl.BlockSpec((b_tile, C, HW_pad), lambda b: (b, 0, 0)),
        ),
        compiler_params=pltpu.CompilerParams(
            dimension_semantics=("parallel",),
            vmem_limit_bytes=32 * 1024 * 1024,   # raise v5e's 16 MiB default; fine on v6e/v7x
        ),
    )(x_flat, w1_t, w2_t)

    if HW_pad != HW:
        out_flat = out_flat[:, :, :HW]
    return out_flat.reshape(B, C, H, W)


def _reference(x, w1, w2):
    # Pure-JAX reference of the PyTorch forward, for a sanity check.
    y = jnp.mean(x, axis=(2, 3))                           # (B, C)
    h = jnp.maximum(y @ w1.T, 0.0)                         # (B, C_red)
    s = jax.nn.sigmoid(h @ w2.T)                           # (B, C)
    return x * s[:, :, None, None]


if __name__ == "__main__":
    # Shapes consistent with SElayer(channel=32, reduction=16): C_red = 2.
    B, C, H, W = 2, 32, 16, 16
    reduction = 16
    C_red = C // reduction

    key = jax.random.PRNGKey(0)
    kx, k1, k2 = jax.random.split(key, 3)

    x = jax.random.normal(kx, (B, C, H, W), dtype=jnp.float32)

    # nn.Linear default init: U(-1/sqrt(fan_in), 1/sqrt(fan_in)), no bias.
    bound1 = 1.0 / (C ** 0.5)
    w1 = jax.random.uniform(k1, (C_red, C), jnp.float32, -bound1, bound1)
    bound2 = 1.0 / (C_red ** 0.5)
    w2 = jax.random.uniform(k2, (C, C_red), jnp.float32, -bound2, bound2)

    out = jax.block_until_ready(se_layer(x, w1, w2))

    ref = _reference(x, w1, w2)
    assert jnp.allclose(out, ref, atol=1e-5, rtol=1e-5), "mismatch vs reference"

    print("KERNEL_OK")
</pallas_src>

<mosaic_0001>
module attributes {stable_mosaic.version = 11 : i64} {
  func.func @_se_kernel(%arg0: i32, %arg1: memref<1x32x256xf32, #tpu.memory_space<vmem>>, %arg2: memref<32x2xf32, #tpu.memory_space<vmem>>, %arg3: memref<2x32xf32, #tpu.memory_space<vmem>>, %arg4: memref<1x32x256xf32, #tpu.memory_space<vmem>>) attributes {dimension_semantics = [#tpu.dimension_semantics<parallel>], iteration_bounds = array<i64: 2>, scalar_prefetch = 0 : i64, scratch_operands = 0 : i64, tpu.core_type = #tpu.core_type<tc>, window_params = [{transform_indices = @transform_0, window_bounds = array<i64: 1, 32, 256>}, {pipeline_mode = #tpu.pipeline_mode<synchronous>, transform_indices = @transform_1, window_bounds = array<i64: 32, 2>}, {pipeline_mode = #tpu.pipeline_mode<synchronous>, transform_indices = @transform_2, window_bounds = array<i64: 2, 32>}, {transform_indices = @transform_3, window_bounds = array<i64: 1, 32, 256>}]} {
    %c0 = arith.constant 0 : index
    %c0_0 = arith.constant 0 : index
    %c0_1 = arith.constant 0 : index
    %0 = vector.load %arg1[%c0, %c0_0, %c0_1] : memref<1x32x256xf32, #tpu.memory_space<vmem>>, vector<1x32x256xf32>
    %cst = arith.constant dense<0.000000e+00> : vector<1x32xf32>
    %1 = vector.multi_reduction <add>, %0, %cst [2] : vector<1x32x256xf32> to vector<1x32xf32>
    %c0_2 = arith.constant 0 : index
    %c0_3 = arith.constant 0 : index
    %2 = vector.load %arg2[%c0_2, %c0_3] : memref<32x2xf32, #tpu.memory_space<vmem>>, vector<32x2xf32>
    %cst_4 = arith.constant dense<0.000000e+00> : vector<1x2xf32>
    %3 = tpu.matmul %1, %2, %cst_4 {dimension_numbers = #tpu.dot_dimension_numbers<[1], [0], [0], [1], [0, 0, 1, 1], [], []>} : vector<1x32xf32>, vector<32x2xf32>, vector<1x2xf32> -> vector<1x2xf32>
    %cst_5 = arith.constant 0.000000e+00 : f32
    %4 = vector.broadcast %cst_5 : f32 to vector<1x2xf32>
    %5 = arith.maximumf %3, %4 : vector<1x2xf32>
    %c0_6 = arith.constant 0 : index
    %c0_7 = arith.constant 0 : index
    %6 = vector.load %arg3[%c0_6, %c0_7] : memref<2x32xf32, #tpu.memory_space<vmem>>, vector<2x32xf32>
    %cst_8 = arith.constant dense<0.000000e+00> : vector<1x32xf32>
    %7 = tpu.matmul %5, %6, %cst_8 {dimension_numbers = #tpu.dot_dimension_numbers<[1], [0], [0], [1], [0, 0, 1, 1], [], []>} : vector<1x2xf32>, vector<2x32xf32>, vector<1x32xf32> -> vector<1x32xf32>
    %8 = arith.negf %7 : vector<1x32xf32>
    %9 = math.exp %8 : vector<1x32xf32>
    %cst_9 = arith.constant 1.000000e+00 : f32
    %10 = vector.broadcast %cst_9 : f32 to vector<1x32xf32>
    %11 = arith.addf %10, %9 : vector<1x32xf32>
    %12 = arith.divf %10, %11 : vector<1x32xf32>
    %13 = vector.shape_cast %12 : vector<1x32xf32> to vector<1x32x1xf32>
    %14 = vector.broadcast %13 : vector<1x32x1xf32> to vector<1x32x256xf32>
    %15 = arith.mulf %0, %14 : vector<1x32x256xf32>
    %c0_10 = arith.constant 0 : index
    %c0_11 = arith.constant 0 : index
    %c0_12 = arith.constant 0 : index
    %16 = vector.load %arg4[%c0_10, %c0_11, %c0_12] : memref<1x32x256xf32, #tpu.memory_space<vmem>>, vector<1x32x256xf32>
    tpu.vector_store %arg4[%c0_10, %c0_11, %c0_12], %15 {strides = array<i32>} : memref<1x32x256xf32, #tpu.memory_space<vmem>>, vector<1x32x256xf32>,
    return
  }
  func.func @transform_0(%arg0: i32) -> (i32, i32, i32) {
    %c0_i32 = arith.constant 0 : i32
    %c0_i32_0 = arith.constant 0 : i32
    %c0_i32_1 = arith.constant 0 : i32
    return %arg0, %c0_i32, %c0_i32_0 : i32, i32, i32
  }
  func.func @transform_1(%arg0: i32) -> (i32, i32) {
    %c0_i32 = arith.constant 0 : i32
    %c0_i32_0 = arith.constant 0 : i32
    %c0_i32_1 = arith.constant 0 : i32
    return %c0_i32, %c0_i32_0 : i32, i32
  }
  func.func @transform_2(%arg0: i32) -> (i32, i32) {
    %c0_i32 = arith.constant 0 : i32
    %c0_i32_0 = arith.constant 0 : i32
    %c0_i32_1 = arith.constant 0 : i32
    return %c0_i32, %c0_i32_0 : i32, i32
  }
  func.func @transform_3(%arg0: i32) -> (i32, i32, i32) {
    %c0_i32 = arith.constant 0 : i32
    %c0_i32_0 = arith.constant 0 : i32
    %c0_i32_1 = arith.constant 0 : i32
    return %arg0, %c0_i32, %c0_i32_0 : i32, i32, i32
  }
}

</mosaic_0001>

<bundles_post_ra>
// kernel: tpu_custom_call.1
= control target key start
LH: loop header
LB: loop body
LE: loop exit
PB: predicated region body
PF: predicated region fallthrough
CT: control target
= control target key end

     0   :  { %8 = vsyncpa [#allocation3], 0  ;;  %s815_s0 = inlined_call_operand.hbm [shape: f32[2,32,256], index: 0, kind: input, shape index: {}]   ;;  %s816_s1 = inlined_call_operand.vmem [shape: f32[32,2], index: 1, kind: input, shape index: {}]   ;;  %s817_s2 = inlined_call_operand.vmem [shape: f32[2,32], index: 2, kind: input, shape index: {}]   ;;  %s818_s3 = inlined_call_operand.hbm [shape: f32[2,32,256], index: 3, kind: output, shape index: {}]  }
   0x1   :  { %10 = vsyncpa [#allocation3 + $0x1], 0 }
   0x2   :  { %11 = vsyncpa [#allocation4], 0 }
   0x3   :  { %13 = vsyncpa [#allocation4 + $0x1], 0  ;;  %s637_s12 = smov 0   ;;  %s639_s13 = smov 0  }
   0x4   :  { %s641_s14 = smov 0   ;;  %s643_s15 = smov 0  }
   0x5 LB: > { %s658_s16 = sadd.s32 4294967295, %s611_s15   ;;  %s436_s17 = sadd.s32 4294967294, %s611_s15   ;;  %s611_s15 = sphi %s643_s15, %s828_s15   ;;  %s607_s14 = sphi %s641_s14, %s827_s14   ;;  %s603_s13 = sphi %s639_s13, %s826_s13   ;;  %s599_s12 = sphi %s637_s12, %s825_s12  }
   0x6   : > { %s662_s18 = sadd.s32 1, %s611_s15   ;;  %s26_s19 = sadd.s32 1, %s607_s14 }
   0x7   : > { %s23_s20 = ssub.s32 %s611_s15, %s662_s18  ;;  %p33_p0 = scmp.ne.s32.totalorder %s607_s14, %s603_s13 }
   0x8   : > { %p24_p1 = scmp.eq.s32.totalorder %s23_s20, 0  ;;  %p34_p2 = scmp.eq.s32.totalorder %s611_s15, 0 }
   0x9   : > { %p39_p3 = scmp.ne.s32.totalorder %s603_s13, %s599_s12  ;;  %p40_p4 = scmp.eq.s32.totalorder %s658_s16, 0 }
   0xa   : > { %s674_s21 = scalar_select %p24_p1, %s607_s14, %s26_s19  }
   0xb   : > { %p676_p5 = por %p34_p2, %p33_p0  ;;  %p680_p6 = por %p40_p4, %p39_p3 }
   0xc   : > { %p105_p7 = scmp.eq.s32.totalorder %s658_s16, 1  ;;  %p111_p8 = scmp.eq.s32.totalorder %s436_s17, 1 }
   0xd   : > { %p468_p10 = scmp.lt.s32.totalorder %s611_s15, 2  ;;  %s137_s26 = sand.u32 1, %s607_s14  }
   0xe   : > { %p687_p11 = por %p105_p7, %p33_p0  ;;  %p691_p12 = por %p111_p8, %p39_p3 }
   0xf   : > { %s454_s27 = sshll.u32 %s611_s15, 6  ;;  %s439_s28 = sshll.u32 %s137_s26, 6 }
  0x10   : > { %s146_s4 = scalar_lea.hbm %s815_s0, %s454_s27  ;;  %s141_s6 = scalar_lea.vmem [#allocation2], %s439_s28 }
  0x11   : > { %s147_s5 = sshll.u32 %s146_s4, 4  ;;  %s149_s7 = sshll.u32 %s141_s6, 4  ;;  %s148_s5 = int_to_ptr.hbm [resolvable:$true] %s147_s5  ;;  %s150_s7 = int_to_ptr.vmem [resolvable:$true] %s149_s7 }
  0x12   : > { %p702_p13 = pnand %p468_p10, %p676_p5  ;;  %p442_p0 = scmp.ge.s32.totalorder %s611_s15, 1 }
  0x13   : > { %p157_p1 = scmp.lt.s32.totalorder %s611_s15, 3  ;;  %s138_s9 = scalar_lea.sflag [#allocation3], %s137_s26 }
  0x14   : > { %s515_s10 = sshra.s32 %s148_s5, 4  ;;  %p519_p3 = pneg %p702_p13  ;;  %s516_s10 = int_to_ptr.hbm [resolvable:$true] %s515_s10 }
  0x15   : > { %s517_s11 = scalar_lea.hbm %s516_s10, 64  ;;  %s522_s20 = scalar_lea.hbm %s815_s0, 128 }
  0x16   : > { %p518_p2 = scmp.ne.s32.totalorder %s516_s10, %s517_s11  ;;  %p523_p5 = scmp.lt.s32.totalorder %s516_s10, %s815_s0 }
  0x17   : > { %p524_p8 = scmp.lt.s32.totalorder %s522_s20, %s517_s11 }
  0x18   : > { %p520_p4 = pnand %p519_p3, %p518_p2 }
  0x19   : > { %p525_p10 = por %p524_p8, %p523_p5 }
  0x1a   : > { %p521_p7 = pneg %p520_p4 }
  0x1c   : > { %p526_p9 = pnand %p525_p10, %p521_p7 }
  0x1e   : > { %529 = shalt.err (!%p526_p9)
}
  0x1f   : > { %s613_s26 = smov 256   ;;  %s614_s28 = smov 16  }
  0x20   : > { %463 = dma.hbm_to_vmem [thread:$0]  (!%p702_p13), %s148_s5, 1024, %s150_s7, %s138_s9, %s613_s26, %s613_s26, %s614_s28  }
  0x21   : > { %p158_p2 = pnand %p442_p0, %p157_p1 }
  0x22   : > { %s723_s29 = sand.u32 (!%p158_p2), 1, %s603_s13  }
  0x23   : > { %161 = sbr.rel (%p158_p2) target bundleno = 581 (0x245), region = 32  ;;  %s443_s30 = sshll.u32 (!%p158_p2), %s723_s29, 6 }
  0x24   : > { %s164_s4 = scalar_lea.sflag (!%p158_p2), [#allocation3], %s723_s29  ;;  %s167_s6 = scalar_lea.vmem (!%p158_p2), [#allocation2], %s443_s30 }
  0x28   : > { %590 = dma.done.wait (%p680_p6), %s164_s4, 1024  }
  0x29   : > { %592 = vsyncadd (%p680_p6), %s164_s4, 4294966272  ;;  %v733_v0 = vld [vmem:[%s167_s6] sm:$0xff]  ;;  %v735_v1 = vld [vmem:[%s167_s6 + $0x8] sm:$0xff]  ;;  %v219_v16 = vlaneseq  ;;  %vm224_vm0 = vcmask 130112   ;;  %vm228_vm1 = vcmask 195712   ;;  %vm232_vm2 = vcmask 261312  }
  0x2a   : > { %v737_v2 = vld [vmem:[%s167_s6 + $0x20] sm:$0xff]  ;;  %v199_v3 = vadd.f32 %v735_v1, %v733_v0  ;;  %v741_v4 = vld [vmem:[%s167_s6 + $0x28] sm:$0xff]  ;;  %v745_v6 = vld [vmem:[%s167_s6 + $0x10] sm:$0xff]  ;;  %vm234_vm3 = vcmask 261120   ;;  %vm263_vm4 = vcmask 1041408   ;;  %vm259_vm5 = vcmask 15360  }
  0x2b   : > { %v205_v5 = vadd.f32 %v741_v4, %v737_v2  ;;  %v747_v7 = vld [vmem:[%s167_s6 + $0x18] sm:$0xff]  ;;  %v749_v8 = vld [vmem:[%s167_s6 + $0x30] sm:$0xff]  ;;  %v212_v14 = vld [vmem:[%s816_s1 + $0x8] sm:$0xff]  ;;  %v220_v19 = vand.u32 127, %v219_v16  ;;  %v308_v35 = vshrl.u32 %v219_v16, 7  ;;  %s190_s22 = scalar_lea.vmem [#allocation5], %s443_s30 }
  0x2c   : > { %200 = vadd.xlane.f32.xlu0 %v199_v3  ;;  %v751_v9 = vld [vmem:[%s167_s6 + $0x38] sm:$0xff]  ;;  %v202_v10 = vadd.f32 %v747_v7, %v745_v6  ;;  %v213_v13 = vld [vmem:[%s816_s1 + $0x10] sm:$0xff]  ;;  %v211_v15 = vld [vmem:[%s816_s1] sm:$0xff]  ;;  %s455_s27 = sshll.u32 %s658_s16, 6  ;;  %s360_s6 = sshll.u32 %s190_s22, 4  ;;  %s361_s6 = int_to_ptr.vmem [resolvable:$true] %s360_s6 }
  0x2d   : > { %206 = vadd.xlane.f32.xlu1 %v205_v5  ;;  %v208_v11 = vadd.f32 %v751_v9, %v749_v8  ;;  %v214_v12 = vld [vmem:[%s816_s1 + $0x18] sm:$0xff]  ;;  %v222_v20 = vadd.s32 4294967288, %v220_v19  ;;  %v226_v21 = vadd.s32 4294967280, %v220_v19  ;;  %v230_v22 = vadd.s32 4294967272, %v220_v19  ;;  %v258_v32 = vld [vmem:[%s817_s2] sm:$0x3]  ;;  %506 = vset.pattern.permute.xlu2 %v308_v35  ;;  %s359_s4 = scalar_lea.hbm %s818_s3, %s455_s27 }
  0x2e   : > { %249 = vmatpush.msra.mxu0 %v214_v12  ;;  %446 = vmatpush.msk.msra.mxu1 %vm263_vm4, %v258_v32  ;;  %v327_v36 = vadd.s32 24, %v308_v35  ;;  %v321_v37 = vadd.s32 16, %v308_v35  ;;  %v315_v53 = vadd.s32 8, %v308_v35  ;;  %s362_s23 = sshll.u32 %s359_s4, 4  ;;  %s348_s16 = scalar_lea.sflag [#allocation4], %s723_s29  ;;  %s363_s23 = int_to_ptr.hbm [resolvable:$true] %s362_s23 }
  0x2f   : > { %s559_s30 = sshra.s32 %s363_s23, 4  ;;  %s565_s9 = scalar_lea.hbm %s818_s3, 128  ;;  %s560_s30 = int_to_ptr.hbm [resolvable:$true] %s559_s30 }
  0x30   : > { %250 = vmatpush.msra.mxu0 %v213_v13  ;;  %509 = vset.pattern.permute.xlu1 %v327_v36  ;;  %s561_s5 = scalar_lea.hbm %s560_s30, 64  ;;  %p566_p0 = scmp.lt.s32.totalorder %s560_s30, %s818_s3 }
  0x31   : > { %508 = vset.pattern.permute.xlu0 %v321_v37  ;;  %p562_p6 = scmp.ne.s32.totalorder %s560_s30, %s561_s5  ;;  %p567_p1 = scmp.lt.s32.totalorder %s565_s9, %s561_s5 }
  0x32   : > { %251 = vmatpush.msra.mxu0 %v212_v14 }
  0x33   : > { %p563_p9 = pnand %p562_p6, %p687_p11  ;;  %p568_p3 = por %p567_p1, %p566_p0 }
  0x34   : > { %203 = vadd.xlane.f32.xlu0 %v202_v10  ;;  %252 = vmatpush.msra.mxu0 %v211_v15 }
  0x35   : > { %209 = vadd.xlane.f32.xlu1 %v208_v11  ;;  %p564_p13 = pneg %p563_p9 }
  0x37   : > { %p569_p4 = pnand %p568_p3, %p564_p13 }
  0x9f   : > { %v201_v17 = vpop.xlane.xlu0 %200 }
  0xa0   : > { %v207_v18 = vpop.xlane.xlu1 %206  ;;  %v221_v24 = vperm.slane %v201_v17, %v220_v19 }
  0xa1   : > { %v227_v27 = vperm.slane %v207_v18, %v226_v21 }
  0xa7   : > { %v204_v23 = vpop.xlane.xlu0 %203 }
  0xa8   : > { %v223_v25 = vperm.slane %v204_v23, %v222_v20  ;;  %v210_v26 = vpop.xlane.xlu1 %209 }
  0xa9   : > { %v231_v28 = vperm.slane %v210_v26, %v230_v22 }
  0xaa   : > { %v225_v29 = vsel %vm224_vm0, %v223_v25, %v221_v24 }
  0xab   : > { %v229_v30 = vsel %vm228_vm1, %v227_v27, %v225_v29 }
  0xac   : > { %v233_v31 = vsel %vm232_vm2, %v231_v28, %v229_v30 }
  0xad   : > { %445 = vmatmul.msk.f32.vlgmr.msra.gmra.mxu0 %vm234_vm3, %v233_v31 }
 0x12a   : > { %v254_v33 = vpop.f32.mrf.mxu0 }
 0x12b   : > { %v257_v34 = vmax.f32 %v254_v33, 0.0 }
 0x12d   : > { %447 = vmatmul.msk.f32.vlgmr.msra.gmra.mxu1 %vm259_vm5, %v257_v34 }
 0x1aa   : > { %v284_v38 = vpop.f32.mrf.mxu1 }
 0x1ab   : > { %v448_v39 = vmul.f32 -1.442695, %v284_v38 }
 0x1ad   : > { %511 = vpow2.f32 %v448_v39 }
 0x1b3   : > { %v512_v40 = vpop.eup %511 }
 0x1b4   : > { %v290_v41 = vadd.f32 1.0, %v512_v40 }
 0x1b6   : > { %513 = vrcp.f32 %v290_v41  ;;  %v302_v45 = vand.u32 2147483648, %v290_v41  ;;  %v300_v47 = vand.u32 2147483647, %v290_v41  ;;  %vm296_vm7 = vweird.f32 %v290_v41 }
 0x1b8   : > { %v303_v49 = vor.u32 1.1754944e-38, %v302_v45  ;;  %vm301_vm9 = vcmp.eq.f32.partialorder %v300_v47, 8.507059e+37 }
 0x1bc   : > { %v514_v42 = vpop.eup %513 }
 0x1bd   : > { %v292_v43 = vmul.f32 %v514_v42, %v290_v41  ;;  %vm297_vm6 = vweird.f32 %v514_v42 }
 0x1be   : > { %vm298_vm8 = vmor %vm296_vm7, %vm297_vm6 }
 0x1bf   : > { %v293_v44 = vsub.f32 1.0, %v292_v43 }
 0x1c1   : > { %v294_v46 = vmul.f32 %v514_v42, %v293_v44 }
 0x1c3   : > { %v295_v48 = vadd.f32 %v514_v42, %v294_v46 }
 0x1c5   : > { %v299_v50 = vsel %vm298_vm8, %v514_v42, %v295_v48 }
 0x1c6   : > { %v304_v51 = vsel %vm301_vm9, %v303_v49, %v299_v50 }
 0x1c7   : > { %v306_v52 = vperm.slane %v304_v51, 0 }
 0x1c9   : > { %329 = vperm.xlu1 %509, %v306_v52   ;;  %323 = vperm.xlu0 %508, %v306_v52  }
 0x1ca   : > { %311 = vperm.xlu2 %506, %v306_v52  }
 0x1d1   : > { %510 = vset.pattern.permute.xlu0 %v327_v36 }
 0x1d2   : > { %507 = vset.pattern.permute.xlu2 %v315_v53 }
 0x1da   : > { %317 = vperm.xlu2 %507, %v306_v52  }
 0x224   : > { %v312_v54 = vpop.permute.xlu2 %311 }
 0x225   : > { %v331_v55 = vmul.f32 %v312_v54, %v733_v0  ;;  %v332_v56 = vmul.f32 %v312_v54, %v735_v1 }
 0x227   : > { %339 = vst [vmem:[%s190_s22] sm:$0xff] %v331_v55 }
 0x228   : > { %340 = vst [vmem:[%s190_s22 + $0x8] sm:$0xff] %v332_v56 }
 0x234   : > { %v318_v57 = vpop.permute.xlu2 %317 }
 0x235   : > { %v333_v58 = vmul.f32 %v318_v57, %v745_v6  ;;  %v334_v59 = vmul.f32 %v318_v57, %v747_v7 }
 0x237   : > { %341 = vst [vmem:[%s190_s22 + $0x10] sm:$0xff] %v333_v58 }
 0x238   : > { %342 = vst [vmem:[%s190_s22 + $0x18] sm:$0xff] %v334_v59 }
 0x23b   : > { %v330_v60 = vpop.permute.xlu1 %329  ;;  %v324_v61 = vpop.permute.xlu0 %323 }
 0x23c   : > { %v337_v62 = vmul.f32 %v330_v60, %v749_v8  ;;  %v338_v63 = vmul.f32 %v330_v60, %v751_v9  ;;  %v335_v0 = vmul.f32 %v324_v61, %v737_v2  ;;  %v336_v1 = vmul.f32 %v324_v61, %v741_v4 }
 0x23e   : > { %345 = vst [vmem:[%s190_s22 + $0x30] sm:$0xff] %v337_v62 }
 0x23f   : > { %346 = vst [vmem:[%s190_s22 + $0x38] sm:$0xff] %v338_v63 }
 0x240   : > { %343 = vst [vmem:[%s190_s22 + $0x20] sm:$0xff] %v335_v0 }
 0x241   : > { %344 = vst [vmem:[%s190_s22 + $0x28] sm:$0xff] %v336_v1 }
 0x242   : > { %572 = shalt.err (!%p569_p4)
}
 0x243   : > { %s615_s29 = smov 256   ;;  %s616_s17 = smov 16  }
 0x244   : > { %458 = dma.vmem_to_hbm [thread:$0]  (%p687_p11), %s361_s6, 1024, %s363_s23, %s348_s16, %s615_s29, %s615_s29, %s616_s17  }
 0x245 PF: > { %s377_s19 = sand.u32 1, %s599_s12   ;;  %p824_p7 = scmp.ge.s32.totalorder %s611_s15, 2 }
 0x246   : > { %s378_s20 = scalar_lea.sflag [#allocation4], %s377_s19 }
 0x247   : > { %p465_p5 = pnand %p824_p7, %p691_p12 }
 0x249   : > { %p466_p8 = pneg %p465_p5 }
 0x24b   : > { %594 = dma.done.wait (%p466_p8), %s378_s20, 1024  }
 0x24c   : > { %596 = vsyncadd (%p466_p8), %s378_s20, 4294966272  ;;  %p16_p10 = scmp.ge.s32.totalorder %s662_s18, 4   ;;  %s825_s12 = smov %s603_s13 }
 0x24d   : > { %s826_s13 = smov %s607_s14  ;;  %s827_s14 = smov %s674_s21 }
 0x24e   : > { %s828_s15 = smov %s662_s18  ;;  %18 = sbr.rel (!%p16_p10) target bundleno = 5 (0x5), region = 77 }
 0x253   :  { %384 = vsyncpa [#allocation3], 1 }
 0x254   :  { %386 = vsyncpa [#allocation3 + $0x1], 1 }
 0x255   :  { %387 = vsyncpa [#allocation4], 1 }
 0x256   :  { %389 = vsyncpa [#allocation4 + $0x1], 1 }

</bundles_post_ra>
